<compile_context>
chip_gen: v5e
topology: v5e:2x2
jax: 0.10.0
libtpu: 0.0.40
codegen_flags: <defaults>
</compile_context>

<pallas_src>
import functools

import jax
import jax.numpy as jnp
from jax import lax
from jax.experimental import pallas as pl
from jax.experimental.pallas import tpu as pltpu

# ----- problem sizes (small, consistent with the module's forward) -----------
T = 8        # sequence length (time steps)
B = 2        # batch
C = 4        # channels (= out_panel of tdBatchNorm)
H = 16
W = 16
EPS = 1e-5   # nn.BatchNorm2d default


def _td_batchnorm_kernel(x_ref, gamma_ref, beta_ref, o_ref, *, inv_count, eps):
    """Whole-problem training-mode batch-norm in one step.

    x_ref     : (N, C, HW)  natural layout (N = T*B, HW = H*W, multiple of 128)
    gamma_ref : (1, C, 1)   per-channel scale
    beta_ref  : (1, C, 1)   per-channel shift
    o_ref     : (N, C, HW)
    """
    x = x_ref[...]                                               # (N, C, HW) f32

    # Per-channel mean: reduce lanes (XLU) then the major axis (VALU adds).
    s_lane = jnp.sum(x, axis=-1, keepdims=True)                  # (N, C, 1)
    mean = jnp.sum(s_lane, axis=0, keepdims=True) * inv_count    # (1, C, 1)

    xc = x - mean                                                # broadcast maj+lane
    sq_lane = jnp.sum(xc * xc, axis=-1, keepdims=True)           # (N, C, 1)
    var = jnp.sum(sq_lane, axis=0, keepdims=True) * inv_count    # biased variance

    scale = gamma_ref[...] * lax.rsqrt(var + eps)                # (1, C, 1)
    o_ref[...] = (xc * scale + beta_ref[...]).astype(o_ref.dtype)


def td_batchnorm_pallas(x_seq, gamma, beta, eps=EPS):
    """Exact tdBatchNorm.forward semantics (training-mode batch statistics).

    x_seq: (T, B, C, H, W) -> (T, B, C, H, W)
    """
    t, b, c, h, w = x_seq.shape
    n = t * b
    hw = h * w

    # SeqToANNContainer: flatten (T, B) -> (T*B).  Pure reshapes only (no
    # transpose, no extra HBM pass) — the kernel consumes the natural layout.
    x3d = x_seq.reshape(n, c, hw)
    gamma3d = gamma.reshape(1, c, 1).astype(jnp.float32)
    beta3d = beta.reshape(1, c, 1).astype(jnp.float32)

    kernel = functools.partial(_td_batchnorm_kernel,
                               inv_count=1.0 / (n * hw), eps=eps)

    y3d = pl.pallas_call(
        kernel,
        out_shape=jax.ShapeDtypeStruct((n, c, hw), x_seq.dtype),
        grid_spec=pltpu.PrefetchScalarGridSpec(
            num_scalar_prefetch=0,
            grid=(1,),                       # single step: whole problem fits VMEM
            in_specs=[
                pl.BlockSpec((n, c, hw), lambda i: (0, 0, 0)),
                pl.BlockSpec((1, c, 1), lambda i: (0, 0, 0)),
                pl.BlockSpec((1, c, 1), lambda i: (0, 0, 0)),
            ],
            out_specs=pl.BlockSpec((n, c, hw), lambda i: (0, 0, 0)),
        ),
        compiler_params=pltpu.CompilerParams(
            dimension_semantics=("arbitrary",)),
    )(x3d, gamma3d, beta3d)

    # Restore (T, B, C, H, W) — again a free reshape (the .view in forward).
    return y3d.reshape(t, b, c, h, w)


def _reference(x_seq, gamma, beta, eps=EPS):
    """Pure-JAX reference matching PyTorch training-mode BatchNorm2d."""
    t, b = x_seq.shape[0], x_seq.shape[1]
    x = x_seq.reshape((t * b,) + x_seq.shape[2:])            # (N, C, H, W)
    mean = jnp.mean(x, axis=(0, 2, 3), keepdims=True)
    var = jnp.mean((x - mean) ** 2, axis=(0, 2, 3), keepdims=True)  # biased
    y = (x - mean) * lax.rsqrt(var + eps)
    y = y * gamma[None, :, None, None] + beta[None, :, None, None]
    return y.reshape((t, b) + y.shape[1:])


if __name__ == "__main__":
    key = jax.random.PRNGKey(0)
    kx, kg, kb = jax.random.split(key, 3)

    x_seq = jax.random.normal(kx, (T, B, C, H, W), dtype=jnp.float32)
    # A fresh nn.BatchNorm2d has gamma=1, beta=0; use nearby random values so
    # the affine path is actually exercised.
    gamma = 1.0 + 0.1 * jax.random.normal(kg, (C,), dtype=jnp.float32)
    beta = 0.1 * jax.random.normal(kb, (C,), dtype=jnp.float32)

    y = jax.block_until_ready(td_batchnorm_pallas(x_seq, gamma, beta))

    y_ref = _reference(x_seq, gamma, beta)
    assert y.shape == (T, B, C, H, W), y.shape
    assert jnp.allclose(y, y_ref, atol=1e-4, rtol=1e-4), float(
        jnp.max(jnp.abs(y - y_ref)))

    print("KERNEL_OK")
</pallas_src>

<mosaic_0001>
module attributes {stable_mosaic.version = 11 : i64} {
  func.func @_td_batchnorm_kernel(%arg0: i32, %arg1: memref<16x4x256xf32, #tpu.memory_space<vmem>>, %arg2: memref<1x4x1xf32, #tpu.memory_space<vmem>>, %arg3: memref<1x4x1xf32, #tpu.memory_space<vmem>>, %arg4: memref<16x4x256xf32, #tpu.memory_space<vmem>>) attributes {dimension_semantics = [#tpu.dimension_semantics<arbitrary>], iteration_bounds = array<i64: 1>, scalar_prefetch = 0 : i64, scratch_operands = 0 : i64, tpu.core_type = #tpu.core_type<tc>, window_params = [{pipeline_mode = #tpu.pipeline_mode<synchronous>, transform_indices = @transform_0, window_bounds = array<i64: 16, 4, 256>}, {pipeline_mode = #tpu.pipeline_mode<synchronous>, transform_indices = @transform_1, window_bounds = array<i64: 1, 4, 1>}, {pipeline_mode = #tpu.pipeline_mode<synchronous>, transform_indices = @transform_2, window_bounds = array<i64: 1, 4, 1>}, {pipeline_mode = #tpu.pipeline_mode<synchronous>, transform_indices = @transform_3, window_bounds = array<i64: 16, 4, 256>}]} {
    %c0 = arith.constant 0 : index
    %c0_0 = arith.constant 0 : index
    %c0_1 = arith.constant 0 : index
    %0 = vector.load %arg1[%c0, %c0_0, %c0_1] : memref<16x4x256xf32, #tpu.memory_space<vmem>>, vector<16x4x256xf32>
    %cst = arith.constant dense<0.000000e+00> : vector<16x4xf32>
    %1 = vector.multi_reduction <add>, %0, %cst [2] : vector<16x4x256xf32> to vector<16x4xf32>
    %2 = vector.shape_cast %1 : vector<16x4xf32> to vector<16x4x1xf32>
    %cst_2 = arith.constant dense<0.000000e+00> : vector<4x1xf32>
    %3 = vector.multi_reduction <add>, %2, %cst_2 [0] : vector<16x4x1xf32> to vector<4x1xf32>
    %4 = vector.shape_cast %3 : vector<4x1xf32> to vector<1x4x1xf32>
    %cst_3 = arith.constant 2.44140625E-4 : f32
    %5 = vector.broadcast %cst_3 : f32 to vector<1x4x1xf32>
    %6 = arith.mulf %4, %5 : vector<1x4x1xf32>
    %7 = vector.broadcast %6 : vector<1x4x1xf32> to vector<16x4x256xf32>
    %8 = arith.subf %0, %7 : vector<16x4x256xf32>
    %9 = arith.mulf %8, %8 : vector<16x4x256xf32>
    %cst_4 = arith.constant dense<0.000000e+00> : vector<16x4xf32>
    %10 = vector.multi_reduction <add>, %9, %cst_4 [2] : vector<16x4x256xf32> to vector<16x4xf32>
    %11 = vector.shape_cast %10 : vector<16x4xf32> to vector<16x4x1xf32>
    %cst_5 = arith.constant dense<0.000000e+00> : vector<4x1xf32>
    %12 = vector.multi_reduction <add>, %11, %cst_5 [0] : vector<16x4x1xf32> to vector<4x1xf32>
    %13 = vector.shape_cast %12 : vector<4x1xf32> to vector<1x4x1xf32>
    %cst_6 = arith.constant 2.44140625E-4 : f32
    %14 = vector.broadcast %cst_6 : f32 to vector<1x4x1xf32>
    %15 = arith.mulf %13, %14 : vector<1x4x1xf32>
    %c0_7 = arith.constant 0 : index
    %c0_8 = arith.constant 0 : index
    %c0_9 = arith.constant 0 : index
    %16 = vector.load %arg2[%c0_7, %c0_8, %c0_9] : memref<1x4x1xf32, #tpu.memory_space<vmem>>, vector<1x4x1xf32>
    %cst_10 = arith.constant 9.99999974E-6 : f32
    %17 = vector.broadcast %cst_10 : f32 to vector<1x4x1xf32>
    %18 = arith.addf %15, %17 : vector<1x4x1xf32>
    %19 = math.rsqrt %18 : vector<1x4x1xf32>
    %20 = arith.mulf %16, %19 : vector<1x4x1xf32>
    %21 = vector.broadcast %20 : vector<1x4x1xf32> to vector<16x4x256xf32>
    %22 = arith.mulf %8, %21 : vector<16x4x256xf32>
    %c0_11 = arith.constant 0 : index
    %c0_12 = arith.constant 0 : index
    %c0_13 = arith.constant 0 : index
    %23 = vector.load %arg3[%c0_11, %c0_12, %c0_13] : memref<1x4x1xf32, #tpu.memory_space<vmem>>, vector<1x4x1xf32>
    %24 = vector.broadcast %23 : vector<1x4x1xf32> to vector<16x4x256xf32>
    %25 = arith.addf %22, %24 : vector<16x4x256xf32>
    %c0_14 = arith.constant 0 : index
    %c0_15 = arith.constant 0 : index
    %c0_16 = arith.constant 0 : index
    %26 = vector.load %arg4[%c0_14, %c0_15, %c0_16] : memref<16x4x256xf32, #tpu.memory_space<vmem>>, vector<16x4x256xf32>
    tpu.vector_store %arg4[%c0_14, %c0_15, %c0_16], %25 {strides = array<i32>} : memref<16x4x256xf32, #tpu.memory_space<vmem>>, vector<16x4x256xf32>,
    return
  }
  func.func @transform_0(%arg0: i32) -> (i32, i32, i32) {
    %c0_i32 = arith.constant 0 : i32
    %c0_i32_0 = arith.constant 0 : i32
    %c0_i32_1 = arith.constant 0 : i32
    %c0_i32_2 = arith.constant 0 : i32
    return %c0_i32, %c0_i32_0, %c0_i32_1 : i32, i32, i32
  }
  func.func @transform_1(%arg0: i32) -> (i32, i32, i32) {
    %c0_i32 = arith.constant 0 : i32
    %c0_i32_0 = arith.constant 0 : i32
    %c0_i32_1 = arith.constant 0 : i32
    %c0_i32_2 = arith.constant 0 : i32
    return %c0_i32, %c0_i32_0, %c0_i32_1 : i32, i32, i32
  }
  func.func @transform_2(%arg0: i32) -> (i32, i32, i32) {
    %c0_i32 = arith.constant 0 : i32
    %c0_i32_0 = arith.constant 0 : i32
    %c0_i32_1 = arith.constant 0 : i32
    %c0_i32_2 = arith.constant 0 : i32
    return %c0_i32, %c0_i32_0, %c0_i32_1 : i32, i32, i32
  }
  func.func @transform_3(%arg0: i32) -> (i32, i32, i32) {
    %c0_i32 = arith.constant 0 : i32
    %c0_i32_0 = arith.constant 0 : i32
    %c0_i32_1 = arith.constant 0 : i32
    %c0_i32_2 = arith.constant 0 : i32
    return %c0_i32, %c0_i32_0, %c0_i32_1 : i32, i32, i32
  }
}

</mosaic_0001>

<bundles_post_ra>
// kernel: tpu_custom_call.1
= control target key start
LH: loop header
LB: loop body
LE: loop exit
PB: predicated region body
PF: predicated region fallthrough
CT: control target
= control target key end

     0   :  { %8 = vsyncpa [#allocation3], 0  ;;  %s976_s0 = inlined_call_operand.hbm [shape: f32[16,4,256], index: 0, kind: input, shape index: {}]   ;;  %s977_s1 = inlined_call_operand.vmem [shape: f32[1,4,1], index: 1, kind: input, shape index: {}]   ;;  %s978_s2 = inlined_call_operand.vmem [shape: f32[1,4,1], index: 2, kind: input, shape index: {}]   ;;  %s979_s3 = inlined_call_operand.hbm [shape: f32[16,4,256], index: 3, kind: output, shape index: {}]  }
   0x1   :  { %9 = vsyncpa [#allocation4], 0  ;;  %s14_s14 = sshll.u32 %s976_s0, 4  ;;  %s669_s15 = smov [#allocation2]   ;;  %s15_s14 = int_to_ptr.hbm [resolvable:$true] %s14_s14 }
   0x2   :  { %s16_s16 = sshll.u32 %s669_s15, 4  ;;  %s670_s17 = smov 128   ;;  %s17_s16 = int_to_ptr.vmem [resolvable:$true] %s16_s16 }
   0x3   :  { %s671_s18 = smov 8  }
   0x4   :  { %22 = dma.hbm_to_vmem [thread:$0]  %s15_s14, 2048, %s17_s16, [#allocation3], %s670_s17, %s670_s17, %s671_s18  }
   0x5   :  { %665 = dma.done.wait [#allocation3], 2048  }
   0x6   :  { %666 = vsyncadd [#allocation3], 4294965248  ;;  %v701_v0 = vld [vmem:[#allocation2] sm:$0xff]  ;;  %v703_v1 = vld [vmem:[#allocation2 + $0x10] sm:$0xff]  ;;  %vm146_vm0 = vcmask 1043456   ;;  %s594_s24 = sshll.u32 %s979_s3, 4  ;;  %s595_s24 = int_to_ptr.hbm [resolvable:$true] %s594_s24 }
   0x7   :  { %63 = vst [vmem:[#allocation1] ss:$2 sm:$0xff] %v701_v0  ;;  %v706_v2 = vld [vmem:[#allocation2 + $0x8] sm:$0xff]  ;;  %v709_v3 = vld [vmem:[#allocation2 + $0x18] sm:$0xff]  ;;  %v713_v4 = vld [vmem:[#allocation2 + $0x20] sm:$0xff] }
   0x8   :  { %71 = vst [vmem:[#allocation1 + $0x20] ss:$2 sm:$0xff] %v703_v1  ;;  %v715_v5 = vld [vmem:[#allocation2 + $0x30] sm:$0xff]  ;;  %v720_v10 = vld [vmem:[#allocation2 + $0x28] sm:$0xff]  ;;  %v725_v16 = vld [vmem:[#allocation2 + $0x38] sm:$0xff] }
   0x9   :  { %67 = vst [vmem:[#allocation1 + $0x10] ss:$2 sm:$0xff] %v706_v2  ;;  %v730_v22 = vld [vmem:[#allocation2 + $0x40] sm:$0xff]  ;;  %v735_v27 = vld [vmem:[#allocation2 + $0x50] sm:$0xff]  ;;  %v740_v33 = vld [vmem:[#allocation2 + $0x48] sm:$0xff] }
   0xa   :  { %75 = vst [vmem:[#allocation1 + $0x30] ss:$2 sm:$0xff] %v709_v3  ;;  %v743_v38 = vld [vmem:[#allocation2 + $0x58] sm:$0xff]  ;;  %v745_v41 = vld [vmem:[#allocation2 + $0x60] sm:$0xff]  ;;  %v755_v50 = vld [vmem:[#allocation2 + $0x70] sm:$0xff] }
   0xb   :  { %v758_v55 = vld [vmem:[#allocation2 + $0x68] sm:$0xff]  ;;  %v761_v59 = vld [vmem:[#allocation2 + $0x78] sm:$0xff] }
   0xe   :  { %v64_v6 = vld.sshfl [vmem:[#allocation1] sm:$0xff pattern:$0x75316420]  ;;  %v65_v7 = vld.sshfl [vmem:[#allocation1 + $0x8] sm:$0xff pattern:$0x75316420] }
   0xf   :  { %v147_v8 = vsel %vm146_vm0, %v64_v6, 0.0  ;;  %v148_v9 = vsel %vm146_vm0, %v65_v7, 0.0  ;;  %78 = vst [vmem:[#allocation1] ss:$2 sm:$0xff] %v713_v4 }
  0x10   :  { %v149_v11 = vadd.f32 %v148_v9, %v147_v8  ;;  %v72_v12 = vld.sshfl [vmem:[#allocation1 + $0x20] sm:$0xff pattern:$0x75316420]  ;;  %v73_v13 = vld.sshfl [vmem:[#allocation1 + $0x28] sm:$0xff pattern:$0x75316420] }
  0x11   :  { %v157_v14 = vsel %vm146_vm0, %v72_v12, 0.0  ;;  %v158_v15 = vsel %vm146_vm0, %v73_v13, 0.0  ;;  %84 = vst [vmem:[#allocation1 + $0x20] ss:$2 sm:$0xff] %v715_v5 }
  0x12   :  { %150 = vadd.xlane.f32.xlu0 %v149_v11  ;;  %v159_v17 = vadd.f32 %v158_v15, %v157_v14  ;;  %v68_v18 = vld.sshfl [vmem:[#allocation1 + $0x10] sm:$0xff pattern:$0x75316420]  ;;  %v69_v19 = vld.sshfl [vmem:[#allocation1 + $0x18] sm:$0xff pattern:$0x75316420] }
  0x13   :  { %81 = vst [vmem:[#allocation1 + $0x10] ss:$2 sm:$0xff] %v720_v10  ;;  %v152_v20 = vsel %vm146_vm0, %v68_v18, 0.0  ;;  %v153_v21 = vsel %vm146_vm0, %v69_v19, 0.0 }
  0x14   :  { %160 = vadd.xlane.f32.xlu1 %v159_v17  ;;  %v76_v23 = vld.sshfl [vmem:[#allocation1 + $0x30] sm:$0xff pattern:$0x75316420]  ;;  %v77_v24 = vld.sshfl [vmem:[#allocation1 + $0x38] sm:$0xff pattern:$0x75316420]  ;;  %v154_v28 = vadd.f32 %v153_v21, %v152_v20 }
  0x15   :  { %87 = vst [vmem:[#allocation1 + $0x30] ss:$2 sm:$0xff] %v725_v16  ;;  %v162_v25 = vsel %vm146_vm0, %v76_v23, 0.0  ;;  %v163_v26 = vsel %vm146_vm0, %v77_v24, 0.0 }
  0x16   :  { %v79_v29 = vld.sshfl [vmem:[#allocation1] sm:$0xff pattern:$0x75316420]  ;;  %v80_v30 = vld.sshfl [vmem:[#allocation1 + $0x8] sm:$0xff pattern:$0x75316420]  ;;  %v164_v35 = vadd.f32 %v163_v26, %v162_v25 }
  0x17   :  { %v167_v31 = vsel %vm146_vm0, %v79_v29, 0.0  ;;  %v168_v32 = vsel %vm146_vm0, %v80_v30, 0.0  ;;  %90 = vst [vmem:[#allocation1] ss:$2 sm:$0xff] %v730_v22 }
  0x18   :  { %v169_v34 = vadd.f32 %v168_v32, %v167_v31  ;;  %v85_v36 = vld.sshfl [vmem:[#allocation1 + $0x20] sm:$0xff pattern:$0x75316420]  ;;  %v86_v37 = vld.sshfl [vmem:[#allocation1 + $0x28] sm:$0xff pattern:$0x75316420] }
  0x19   :  { %96 = vst [vmem:[#allocation1 + $0x20] ss:$2 sm:$0xff] %v735_v27  ;;  %v177_v44 = vsel %vm146_vm0, %v85_v36, 0.0  ;;  %v178_v45 = vsel %vm146_vm0, %v86_v37, 0.0 }
  0x1a   :  { %155 = vadd.xlane.f32.xlu0 %v154_v28  ;;  %170 = vadd.xlane.f32.xlu2 %v169_v34  ;;  %v82_v39 = vld.sshfl [vmem:[#allocation1 + $0x10] sm:$0xff pattern:$0x75316420]  ;;  %v83_v40 = vld.sshfl [vmem:[#allocation1 + $0x18] sm:$0xff pattern:$0x75316420]  ;;  %v179_v52 = vadd.f32 %v178_v45, %v177_v44 }
  0x1b   :  { %93 = vst [vmem:[#allocation1 + $0x10] ss:$2 sm:$0xff] %v740_v33  ;;  %v172_v42 = vsel %vm146_vm0, %v82_v39, 0.0  ;;  %v173_v43 = vsel %vm146_vm0, %v83_v40, 0.0 }
  0x1c   :  { %165 = vadd.xlane.f32.xlu1 %v164_v35  ;;  %v88_v46 = vld.sshfl [vmem:[#allocation1 + $0x30] sm:$0xff pattern:$0x75316420]  ;;  %v89_v47 = vld.sshfl [vmem:[#allocation1 + $0x38] sm:$0xff pattern:$0x75316420]  ;;  %v174_v51 = vadd.f32 %v173_v43, %v172_v42 }
  0x1d   :  { %99 = vst [vmem:[#allocation1 + $0x30] ss:$2 sm:$0xff] %v743_v38  ;;  %v182_v48 = vsel %vm146_vm0, %v88_v46, 0.0  ;;  %v183_v49 = vsel %vm146_vm0, %v89_v47, 0.0 }
  0x1e   :  { %v91_v53 = vld.sshfl [vmem:[#allocation1] sm:$0xff pattern:$0x75316420]  ;;  %v92_v54 = vld.sshfl [vmem:[#allocation1 + $0x8] sm:$0xff pattern:$0x75316420]  ;;  %v184_v56 = vadd.f32 %v183_v49, %v182_v48 }
  0x1f   :  { %102 = vst [vmem:[#allocation1] ss:$2 sm:$0xff] %v745_v41  ;;  %v187_v62 = vsel %vm146_vm0, %v91_v53, 0.0  ;;  %v188_v63 = vsel %vm146_vm0, %v92_v54, 0.0 }
  0x20   :  { %v97_v57 = vld.sshfl [vmem:[#allocation1 + $0x20] sm:$0xff pattern:$0x75316420]  ;;  %v98_v58 = vld.sshfl [vmem:[#allocation1 + $0x28] sm:$0xff pattern:$0x75316420]  ;;  %v189_v13 = vadd.f32 %v188_v63, %v187_v62 }
  0x21   :  { %108 = vst [vmem:[#allocation1 + $0x20] ss:$2 sm:$0xff] %v755_v50  ;;  %v197_v11 = vsel %vm146_vm0, %v97_v57, 0.0  ;;  %v198_v12 = vsel %vm146_vm0, %v98_v58, 0.0 }
  0x22   :  { %175 = vadd.xlane.f32.xlu2 %v174_v51  ;;  %180 = vadd.xlane.f32.xlu0 %v179_v52  ;;  %v94_v60 = vld.sshfl [vmem:[#allocation1 + $0x10] sm:$0xff pattern:$0x75316420]  ;;  %v95_v61 = vld.sshfl [vmem:[#allocation1 + $0x18] sm:$0xff pattern:$0x75316420]  ;;  %v199_v15 = vadd.f32 %v198_v12, %v197_v11 }
  0x23   :  { %105 = vst [vmem:[#allocation1 + $0x10] ss:$2 sm:$0xff] %v758_v55  ;;  %v192_v6 = vsel %vm146_vm0, %v94_v60, 0.0  ;;  %v193_v7 = vsel %vm146_vm0, %v95_v61, 0.0 }
  0x24   :  { %185 = vadd.xlane.f32.xlu1 %v184_v56  ;;  %v100_v8 = vld.sshfl [vmem:[#allocation1 + $0x30] sm:$0xff pattern:$0x75316420]  ;;  %v101_v9 = vld.sshfl [vmem:[#allocation1 + $0x38] sm:$0xff pattern:$0x75316420]  ;;  %v194_v14 = vadd.f32 %v193_v7, %v192_v6 }
  0x25   :  { %111 = vst [vmem:[#allocation1 + $0x30] ss:$2 sm:$0xff] %v761_v59  ;;  %v202_v21 = vsel %vm146_vm0, %v100_v8, 0.0  ;;  %v203_v23 = vsel %vm146_vm0, %v101_v9, 0.0 }
  0x26   :  { %v103_v17 = vld.sshfl [vmem:[#allocation1] sm:$0xff pattern:$0x75316420]  ;;  %v104_v18 = vld.sshfl [vmem:[#allocation1 + $0x8] sm:$0xff pattern:$0x75316420]  ;;  %v204_v29 = vadd.f32 %v203_v23, %v202_v21 }
  0x27   :  { %v207_v24 = vsel %vm146_vm0, %v103_v17, 0.0  ;;  %v208_v25 = vsel %vm146_vm0, %v104_v18, 0.0 }
  0x28   :  { %v209_v30 = vadd.f32 %v208_v25, %v207_v24  ;;  %v109_v31 = vld.sshfl [vmem:[#allocation1 + $0x20] sm:$0xff pattern:$0x75316420]  ;;  %v110_v32 = vld.sshfl [vmem:[#allocation1 + $0x28] sm:$0xff pattern:$0x75316420] }
  0x29   :  { %v217_v37 = vsel %vm146_vm0, %v109_v31, 0.0  ;;  %v218_v39 = vsel %vm146_vm0, %v110_v32, 0.0 }
  0x2a   :  { %190 = vadd.xlane.f32.xlu2 %v189_v13  ;;  %195 = vadd.xlane.f32.xlu0 %v194_v14  ;;  %v106_v19 = vld.sshfl [vmem:[#allocation1 + $0x10] sm:$0xff pattern:$0x75316420]  ;;  %v107_v20 = vld.sshfl [vmem:[#allocation1 + $0x18] sm:$0xff pattern:$0x75316420]  ;;  %v219_v43 = vadd.f32 %v218_v39, %v217_v37 }
  0x2b   :  { %v212_v26 = vsel %vm146_vm0, %v106_v19, 0.0  ;;  %v213_v28 = vsel %vm146_vm0, %v107_v20, 0.0 }
  0x2c   :  { %200 = vadd.xlane.f32.xlu1 %v199_v15  ;;  %v214_v34 = vadd.f32 %v213_v28, %v212_v26  ;;  %v112_v35 = vld.sshfl [vmem:[#allocation1 + $0x30] sm:$0xff pattern:$0x75316420]  ;;  %v113_v36 = vld.sshfl [vmem:[#allocation1 + $0x38] sm:$0xff pattern:$0x75316420] }
  0x2d   :  { %v222_v40 = vsel %vm146_vm0, %v112_v35, 0.0  ;;  %v223_v42 = vsel %vm146_vm0, %v113_v36, 0.0 }
  0x2e   :  { %v224_v44 = vadd.f32 %v223_v42, %v222_v40 }
  0x32   :  { %205 = vadd.xlane.f32.xlu2 %v204_v29  ;;  %210 = vadd.xlane.f32.xlu0 %v209_v30 }
  0x34   :  { %215 = vadd.xlane.f32.xlu1 %v214_v34 }
  0x3a   :  { %220 = vadd.xlane.f32.xlu2 %v219_v43  ;;  %225 = vadd.xlane.f32.xlu0 %v224_v44  ;;  %v672_v43 = vmov 839922192  }
  0x3b   :  { %v261_v44 = vunpack.c.l.s4 %v672_v43 }
  0x85   :  { %v151_v45 = vpop.xlane.xlu0 %150 }
  0x86   :  { %v227_v49 = vsel %vm146_vm0, %v151_v45, 0.0 }
  0x87   :  { %v161_v46 = vpop.xlane.xlu1 %160 }
  0x88   :  { %v230_v54 = vsel %vm146_vm0, %v161_v46, 0.0  ;;  %v797_v46 = vunpack.c.0.s8 %v261_v44 }
  0x8d   :  { %v156_v47 = vpop.xlane.xlu0 %155  ;;  %v171_v48 = vpop.xlane.xlu2 %170 }
  0x8e   :  { %v228_v51 = vsel %vm146_vm0, %v156_v47, 0.0  ;;  %v234_v60 = vsel %vm146_vm0, %v171_v48, 0.0 }
  0x8f   :  { %v229_v52 = vadd.f32 %v228_v51, %v227_v49  ;;  %v166_v53 = vpop.xlane.xlu1 %165 }
  0x90   :  { %v232_v56 = vsel %vm146_vm0, %v166_v53, 0.0 }
  0x91   :  { %v231_v57 = vadd.f32 %v230_v54, %v229_v52 }
  0x93   :  { %v233_v58 = vadd.f32 %v232_v56, %v231_v57 }
  0x95   :  { %v235_v61 = vadd.f32 %v234_v60, %v233_v58  ;;  %v176_v62 = vpop.xlane.xlu2 %175  ;;  %v181_v63 = vpop.xlane.xlu0 %180 }
  0x96   :  { %v236_v6 = vsel %vm146_vm0, %v176_v62, 0.0  ;;  %v238_v7 = vsel %vm146_vm0, %v181_v63, 0.0 }
  0x97   :  { %v237_v8 = vadd.f32 %v236_v6, %v235_v61  ;;  %v186_v9 = vpop.xlane.xlu1 %185 }
  0x98   :  { %v240_v12 = vsel %vm146_vm0, %v186_v9, 0.0 }
  0x99   :  { %v239_v11 = vadd.f32 %v238_v7, %v237_v8 }
  0x9b   :  { %v241_v13 = vadd.f32 %v240_v12, %v239_v11 }
  0x9d   :  { %v191_v14 = vpop.xlane.xlu2 %190  ;;  %v196_v15 = vpop.xlane.xlu0 %195 }
  0x9e   :  { %v242_v17 = vsel %vm146_vm0, %v191_v14, 0.0  ;;  %v244_v18 = vsel %vm146_vm0, %v196_v15, 0.0 }
  0x9f   :  { %v243_v19 = vadd.f32 %v242_v17, %v241_v13  ;;  %v201_v20 = vpop.xlane.xlu1 %200 }
  0xa0   :  { %v246_v23 = vsel %vm146_vm0, %v201_v20, 0.0 }
  0xa1   :  { %v245_v21 = vadd.f32 %v244_v18, %v243_v19 }
  0xa3   :  { %v247_v24 = vadd.f32 %v246_v23, %v245_v21 }
  0xa5   :  { %v206_v25 = vpop.xlane.xlu2 %205  ;;  %v211_v26 = vpop.xlane.xlu0 %210 }
  0xa6   :  { %v248_v28 = vsel %vm146_vm0, %v206_v25, 0.0  ;;  %v250_v29 = vsel %vm146_vm0, %v211_v26, 0.0 }
  0xa7   :  { %v249_v30 = vadd.f32 %v248_v28, %v247_v24  ;;  %v216_v31 = vpop.xlane.xlu1 %215 }
  0xa8   :  { %v252_v34 = vsel %vm146_vm0, %v216_v31, 0.0 }
  0xa9   :  { %v251_v32 = vadd.f32 %v250_v29, %v249_v30 }
  0xab   :  { %v253_v35 = vadd.f32 %v252_v34, %v251_v32 }
  0xad   :  { %v221_v36 = vpop.xlane.xlu2 %220  ;;  %v226_v37 = vpop.xlane.xlu0 %225 }
  0xae   :  { %v254_v39 = vsel %vm146_vm0, %v221_v36, 0.0  ;;  %v256_v40 = vsel %vm146_vm0, %v226_v37, 0.0 }
  0xaf   :  { %v255_v42 = vadd.f32 %v254_v39, %v253_v35 }
  0xb1   :  { %v257_v45 = vadd.f32 %v256_v40, %v255_v42 }
  0xb3   :  { %v258_v47 = vmul.f32 0.00024414063, %v257_v45 }
  0xb5   :  { %v800_v48 = vperm.slane %v258_v47, %v797_v46 }
  0xb7   :  { %v804_v49 = vsub.f32 %v703_v1, %v800_v48  ;;  %v808_v51 = vsub.f32 %v706_v2, %v800_v48  ;;  %v812_v52 = vsub.f32 %v701_v0, %v800_v48  ;;  %v816_v53 = vsub.f32 %v709_v3, %v800_v48 }
  0xb8   :  { %v828_v0 = vsub.f32 %v715_v5, %v800_v48  ;;  %v832_v3 = vsub.f32 %v720_v10, %v800_v48  ;;  %v836_v57 = vsub.f32 %v713_v4, %v800_v48  ;;  %v846_v10 = vsub.f32 %v725_v16, %v800_v48 }
  0xb9   :  { %v283_v54 = vmul.f32 %v804_v49, %v804_v49  ;;  %v282_v56 = vmul.f32 %v808_v51, %v808_v51  ;;  %v281_v1 = vmul.f32 %v812_v52, %v812_v52  ;;  %v284_v2 = vmul.f32 %v816_v53, %v816_v53 }
  0xba   :  { %v287_v61 = vmul.f32 %v828_v0, %v828_v0  ;;  %v286_v5 = vmul.f32 %v832_v3, %v832_v3  ;;  %v285_v12 = vmul.f32 %v836_v57, %v836_v57  ;;  %v855_v16 = vsub.f32 %v740_v33, %v800_v48 }
  0xbb   :  { %321 = vst [vmem:[#allocation1 + $0x20] ss:$2 sm:$0xff] %v283_v54  ;;  %v288_v19 = vmul.f32 %v846_v10, %v846_v10  ;;  %v862_v20 = vsub.f32 %v730_v22, %v800_v48  ;;  %v866_v24 = vsub.f32 %v735_v27, %v800_v48  ;;  %v872_v28 = vsub.f32 %v743_v38, %v800_v48 }
  0xbc   :  { %317 = vst [vmem:[#allocation1 + $0x10] ss:$2 sm:$0xff] %v282_v56  ;;  %v290_v33 = vmul.f32 %v855_v16, %v855_v16  ;;  %v884_v39 = vsub.f32 %v745_v41, %v800_v48  ;;  %v888_v40 = vsub.f32 %v758_v55, %v800_v48  ;;  %v896_v41 = vsub.f32 %v755_v50, %v800_v48 }
  0xbd   :  { %313 = vst [vmem:[#allocation1] ss:$2 sm:$0xff] %v281_v1  ;;  %v289_v22 = vmul.f32 %v862_v20, %v862_v20  ;;  %v291_v35 = vmul.f32 %v866_v24, %v866_v24  ;;  %v292_v44 = vmul.f32 %v872_v28, %v872_v28  ;;  %v902_v1 = vsub.f32 %v761_v59, %v800_v48 }
  0xbe   :  { %325 = vst [vmem:[#allocation1 + $0x30] ss:$2 sm:$0xff] %v284_v2  ;;  %v294_v55 = vmul.f32 %v888_v40, %v888_v40  ;;  %v293_v2 = vmul.f32 %v884_v39, %v884_v39  ;;  %v295_v59 = vmul.f32 %v896_v41, %v896_v41 }
  0xc2   :  { %v322_v58 = vld.sshfl [vmem:[#allocation1 + $0x20] sm:$0xff pattern:$0x75316420]  ;;  %v323_v60 = vld.sshfl [vmem:[#allocation1 + $0x28] sm:$0xff pattern:$0x75316420] }
  0xc3   :  { %v406_v62 = vsel %vm146_vm0, %v322_v58, 0.0  ;;  %v407_v63 = vsel %vm146_vm0, %v323_v60, 0.0  ;;  %v318_v6 = vld.sshfl [vmem:[#allocation1 + $0x10] sm:$0xff pattern:$0x75316420] }
  0xc4   :  { %v408_v7 = vadd.f32 %v407_v63, %v406_v62  ;;  %v319_v4 = vld.sshfl [vmem:[#allocation1 + $0x18] sm:$0xff pattern:$0x75316420]  ;;  %v401_v8 = vsel %vm146_vm0, %v318_v6, 0.0  ;;  %334 = vst [vmem:[#allocation1 + $0x20] ss:$2 sm:$0xff] %v287_v61 }
  0xc5   :  { %v402_v9 = vsel %vm146_vm0, %v319_v4, 0.0  ;;  %v314_v11 = vld.sshfl [vmem:[#allocation1] sm:$0xff pattern:$0x75316420]  ;;  %331 = vst [vmem:[#allocation1 + $0x10] ss:$2 sm:$0xff] %v286_v5 }
  0xc6   :  { %409 = vadd.xlane.f32.xlu0 %v408_v7  ;;  %v403_v13 = vadd.f32 %v402_v9, %v401_v8  ;;  %v315_v14 = vld.sshfl [vmem:[#allocation1 + $0x8] sm:$0xff pattern:$0x75316420]  ;;  %v396_v15 = vsel %vm146_vm0, %v314_v11, 0.0 }
  0xc7   :  { %v397_v17 = vsel %vm146_vm0, %v315_v14, 0.0  ;;  %v326_v18 = vld.sshfl [vmem:[#allocation1 + $0x30] sm:$0xff pattern:$0x75316420]  ;;  %328 = vst [vmem:[#allocation1] ss:$2 sm:$0xff] %v285_v12 }
  0xc8   :  { %404 = vadd.xlane.f32.xlu2 %v403_v13  ;;  %v398_v21 = vadd.f32 %v397_v17, %v396_v15  ;;  %v327_v23 = vld.sshfl [vmem:[#allocation1 + $0x38] sm:$0xff pattern:$0x75316420]  ;;  %v411_v32 = vsel %vm146_vm0, %v326_v18, 0.0  ;;  %v296_v13 = vmul.f32 %v902_v1, %v902_v1 }
  0xc9   :  { %337 = vst [vmem:[#allocation1 + $0x30] ss:$2 sm:$0xff] %v288_v19  ;;  %v412_v34 = vsel %vm146_vm0, %v327_v23, 0.0 }
  0xca   :  { %399 = vadd.xlane.f32.xlu1 %v398_v21  ;;  %v413_v45 = vadd.f32 %v412_v34, %v411_v32 }
  0xcb   :  { %v335_v25 = vld.sshfl [vmem:[#allocation1 + $0x20] sm:$0xff pattern:$0x75316420]  ;;  %v336_v26 = vld.sshfl [vmem:[#allocation1 + $0x28] sm:$0xff pattern:$0x75316420] }
  0xcc   :  { %v332_v29 = vld.sshfl [vmem:[#allocation1 + $0x10] sm:$0xff pattern:$0x75316420]  ;;  %v333_v30 = vld.sshfl [vmem:[#allocation1 + $0x18] sm:$0xff pattern:$0x75316420] }
  0xcd   :  { %v421_v31 = vsel %vm146_vm0, %v332_v29, 0.0  ;;  %v422_v27 = vsel %vm146_vm0, %v333_v30, 0.0  ;;  %343 = vst [vmem:[#allocation1 + $0x10] ss:$2 sm:$0xff] %v290_v33  ;;  %v426_v61 = vsel %vm146_vm0, %v335_v25, 0.0  ;;  %v427_v62 = vsel %vm146_vm0, %v336_v26, 0.0 }
  0xce   :  { %v423_v36 = vadd.f32 %v422_v27, %v421_v31  ;;  %v329_v38 = vld.sshfl [vmem:[#allocation1] sm:$0xff pattern:$0x75316420]  ;;  %v330_v37 = vld.sshfl [vmem:[#allocation1 + $0x8] sm:$0xff pattern:$0x75316420]  ;;  %v428_v4 = vadd.f32 %v427_v62, %v426_v61 }
  0xcf   :  { %v416_v42 = vsel %vm146_vm0, %v329_v38, 0.0  ;;  %v417_v43 = vsel %vm146_vm0, %v330_v37, 0.0  ;;  %340 = vst [vmem:[#allocation1] ss:$2 sm:$0xff] %v289_v22 }
  0xd0   :  { %424 = vadd.xlane.f32.xlu0 %v423_v36  ;;  %v418_v47 = vadd.f32 %v417_v43, %v416_v42  ;;  %346 = vst [vmem:[#allocation1 + $0x20] ss:$2 sm:$0xff] %v291_v35  ;;  %v338_v54 = vld.sshfl [vmem:[#allocation1 + $0x30] sm:$0xff pattern:$0x75316420] }
  0xd1   :  { %v339_v56 = vld.sshfl [vmem:[#allocation1 + $0x38] sm:$0xff pattern:$0x75316420]  ;;  %v431_v63 = vsel %vm146_vm0, %v338_v54, 0.0 }
  0xd2   :  { %414 = vadd.xlane.f32.xlu1 %v413_v45  ;;  %419 = vadd.xlane.f32.xlu2 %v418_v47  ;;  %349 = vst [vmem:[#allocation1 + $0x30] ss:$2 sm:$0xff] %v292_v44  ;;  %v432_v50 = vsel %vm146_vm0, %v339_v56, 0.0 }
  0xd3   :  { %v433_v8 = vadd.f32 %v432_v50, %v431_v63 }
  0xd4   :  { %v344_v58 = vld.sshfl [vmem:[#allocation1 + $0x10] sm:$0xff pattern:$0x75316420]  ;;  %v345_v60 = vld.sshfl [vmem:[#allocation1 + $0x18] sm:$0xff pattern:$0x75316420] }
  0xd5   :  { %355 = vst [vmem:[#allocation1 + $0x10] ss:$2 sm:$0xff] %v294_v55  ;;  %v441_v17 = vsel %vm146_vm0, %v344_v58, 0.0  ;;  %v442_v18 = vsel %vm146_vm0, %v345_v60, 0.0 }
  0xd6   :  { %v341_v6 = vld.sshfl [vmem:[#allocation1] sm:$0xff pattern:$0x75316420]  ;;  %v342_v5 = vld.sshfl [vmem:[#allocation1 + $0x8] sm:$0xff pattern:$0x75316420]  ;;  %v443_v25 = vadd.f32 %v442_v18, %v441_v17 }
  0xd7   :  { %v436_v48 = vsel %vm146_vm0, %v341_v6, 0.0  ;;  %v437_v7 = vsel %vm146_vm0, %v342_v5, 0.0  ;;  %352 = vst [vmem:[#allocation1] ss:$2 sm:$0xff] %v293_v2 }
  0xd8   :  { %v438_v9 = vadd.f32 %v437_v7, %v436_v48  ;;  %v347_v11 = vld.sshfl [vmem:[#allocation1 + $0x20] sm:$0xff pattern:$0x75316420]  ;;  %v348_v12 = vld.sshfl [vmem:[#allocation1 + $0x28] sm:$0xff pattern:$0x75316420] }
  0xd9   :  { %358 = vst [vmem:[#allocation1 + $0x20] ss:$2 sm:$0xff] %v295_v59  ;;  %v350_v14 = vld.sshfl [vmem:[#allocation1 + $0x30] sm:$0xff pattern:$0x75316420]  ;;  %v446_v19 = vsel %vm146_vm0, %v347_v11, 0.0 }
  0xda   :  { %429 = vadd.xlane.f32.xlu1 %v428_v4  ;;  %434 = vadd.xlane.f32.xlu2 %v433_v8  ;;  %v351_v15 = vld.sshfl [vmem:[#allocation1 + $0x38] sm:$0xff pattern:$0x75316420]  ;;  %v447_v21 = vsel %vm146_vm0, %v348_v12, 0.0  ;;  %v451_v23 = vsel %vm146_vm0, %v350_v14, 0.0 }
  0xdb   :  { %439 = vadd.xlane.f32.xlu0 %v438_v9  ;;  %361 = vst [vmem:[#allocation1 + $0x30] ss:$2 sm:$0xff] %v296_v13  ;;  %v452_v33 = vsel %vm146_vm0, %v351_v15, 0.0  ;;  %v448_v26 = vadd.f32 %v447_v21, %v446_v19  ;;  %v673_v21 = vmov 0  }
  0xdc   :  { %v453_v22 = vadd.f32 %v452_v33, %v451_v23  ;;  %v356_v29 = vld.sshfl [vmem:[#allocation1 + $0x10] sm:$0xff pattern:$0x75316420]  ;;  %v357_v30 = vld.sshfl [vmem:[#allocation1 + $0x18] sm:$0xff pattern:$0x75316420]  ;;  %614 = vset.pattern.permute.xlu0 %v673_v21  ;;  %613 = vset.pattern.permute.xlu2 %v673_v21 }
  0xdd   :  { %v461_v35 = vsel %vm146_vm0, %v356_v29, 0.0  ;;  %v462_v36 = vsel %vm146_vm0, %v357_v30, 0.0  ;;  %v546_v23 = vld [vmem:[%s978_s2] sm:$0xf] }
  0xde   :  { %v353_v31 = vld.sshfl [vmem:[#allocation1] sm:$0xff pattern:$0x75316420]  ;;  %v354_v27 = vld.sshfl [vmem:[#allocation1 + $0x8] sm:$0xff pattern:$0x75316420]  ;;  %v463_v44 = vadd.f32 %v462_v36, %v461_v35 }
  0xdf   :  { %v456_v38 = vsel %vm146_vm0, %v353_v31, 0.0  ;;  %v457_v37 = vsel %vm146_vm0, %v354_v27, 0.0 }
  0xe0   :  { %v359_v32 = vld.sshfl [vmem:[#allocation1 + $0x20] sm:$0xff pattern:$0x75316420]  ;;  %v360_v34 = vld.sshfl [vmem:[#allocation1 + $0x28] sm:$0xff pattern:$0x75316420]  ;;  %v458_v45 = vadd.f32 %v457_v37, %v456_v38 }
  0xe1   :  { %v466_v42 = vsel %vm146_vm0, %v359_v32, 0.0  ;;  %v467_v43 = vsel %vm146_vm0, %v360_v34, 0.0 }
  0xe2   :  { %444 = vadd.xlane.f32.xlu1 %v443_v25  ;;  %449 = vadd.xlane.f32.xlu2 %v448_v26  ;;  %v468_v47 = vadd.f32 %v467_v43, %v466_v42  ;;  %v362_v54 = vld.sshfl [vmem:[#allocation1 + $0x30] sm:$0xff pattern:$0x75316420]  ;;  %v363_v56 = vld.sshfl [vmem:[#allocation1 + $0x38] sm:$0xff pattern:$0x75316420] }
  0xe3   :  { %454 = vadd.xlane.f32.xlu0 %v453_v22  ;;  %v471_v55 = vsel %vm146_vm0, %v362_v54, 0.0  ;;  %v472_v2 = vsel %vm146_vm0, %v363_v56, 0.0 }
  0xe4   :  { %v473_v58 = vadd.f32 %v472_v2, %v471_v55 }
  0xea   :  { %464 = vadd.xlane.f32.xlu2 %v463_v44  ;;  %459 = vadd.xlane.f32.xlu1 %v458_v45 }
  0xeb   :  { %469 = vadd.xlane.f32.xlu0 %v468_v47 }
  0xf2   :  { %474 = vadd.xlane.f32.xlu1 %v473_v58 }
  0xff   :  { %549 = vperm.xlu0 %614, %v546_v23  }
 0x139   :  { %v410_v60 = vpop.xlane.xlu0 %409 }
 0x13a   :  { %v479_v5 = vsel %vm146_vm0, %v410_v60, 0.0 }
 0x13b   :  { %v405_v61 = vpop.xlane.xlu2 %404 }
 0x13c   :  { %v477_v63 = vsel %vm146_vm0, %v405_v61, 0.0 }
 0x13d   :  { %v400_v62 = vpop.xlane.xlu1 %399 }
 0x13e   :  { %v476_v50 = vsel %vm146_vm0, %v400_v62, 0.0 }
 0x13f   :  { %v478_v6 = vadd.f32 %v477_v63, %v476_v50 }
 0x141   :  { %v480_v48 = vadd.f32 %v479_v5, %v478_v6 }
 0x143   :  { %v425_v59 = vpop.xlane.xlu0 %424 }
 0x144   :  { %v485_v13 = vsel %vm146_vm0, %v425_v59, 0.0 }
 0x145   :  { %v415_v7 = vpop.xlane.xlu1 %414  ;;  %v420_v4 = vpop.xlane.xlu2 %419 }
 0x146   :  { %v481_v8 = vsel %vm146_vm0, %v415_v7, 0.0  ;;  %v483_v11 = vsel %vm146_vm0, %v420_v4, 0.0  ;;  %v508_v7 = vld [vmem:[%s977_s1] sm:$0xf]  ;;  %s674_s1 = smov [#allocation5]  }
 0x147   :  { %v482_v9 = vadd.f32 %v481_v8, %v480_v48  ;;  %s592_s21 = sshll.u32 %s674_s1, 4  ;;  %s593_s21 = int_to_ptr.vmem [resolvable:$true] %s592_s21 }
 0x149   :  { %v484_v12 = vadd.f32 %v483_v11, %v482_v9 }
 0x14b   :  { %v486_v15 = vadd.f32 %v485_v13, %v484_v12 }
 0x14d   :  { %v430_v14 = vpop.xlane.xlu1 %429  ;;  %v435_v17 = vpop.xlane.xlu2 %434 }
 0x14e   :  { %v487_v18 = vsel %vm146_vm0, %v430_v14, 0.0  ;;  %v440_v19 = vpop.xlane.xlu0 %439  ;;  %v489_v25 = vsel %vm146_vm0, %v435_v17, 0.0 }
 0x14f   :  { %v488_v33 = vadd.f32 %v487_v18, %v486_v15  ;;  %v491_v22 = vsel %vm146_vm0, %v440_v19, 0.0 }
 0x151   :  { %v490_v26 = vadd.f32 %v489_v25, %v488_v33 }
 0x153   :  { %v492_v29 = vadd.f32 %v491_v22, %v490_v26 }
 0x155   :  { %v445_v30 = vpop.xlane.xlu1 %444  ;;  %v450_v31 = vpop.xlane.xlu2 %449 }
 0x156   :  { %v493_v27 = vsel %vm146_vm0, %v445_v30, 0.0  ;;  %v455_v34 = vpop.xlane.xlu0 %454  ;;  %v495_v35 = vsel %vm146_vm0, %v450_v31, 0.0 }
 0x157   :  { %v494_v32 = vadd.f32 %v493_v27, %v492_v29  ;;  %v497_v38 = vsel %vm146_vm0, %v455_v34, 0.0 }
 0x159   :  { %v496_v36 = vadd.f32 %v495_v35, %v494_v32 }
 0x15b   :  { %v498_v37 = vadd.f32 %v497_v38, %v496_v36 }
 0x15d   :  { %v465_v42 = vpop.xlane.xlu2 %464  ;;  %v460_v43 = vpop.xlane.xlu1 %459 }
 0x15e   :  { %v499_v44 = vsel %vm146_vm0, %v460_v43, 0.0  ;;  %v501_v47 = vsel %vm146_vm0, %v465_v42, 0.0  ;;  %v470_v54 = vpop.xlane.xlu0 %469 }
 0x15f   :  { %v500_v45 = vadd.f32 %v499_v44, %v498_v37  ;;  %v503_v55 = vsel %vm146_vm0, %v470_v54, 0.0 }
 0x161   :  { %v502_v56 = vadd.f32 %v501_v47, %v500_v45 }
 0x163   :  { %v504_v2 = vadd.f32 %v503_v55, %v502_v56 }
 0x165   :  { %v475_v58 = vpop.xlane.xlu1 %474 }
 0x166   :  { %v505_v60 = vsel %vm146_vm0, %v475_v58, 0.0 }
 0x167   :  { %v506_v61 = vadd.f32 %v505_v60, %v504_v2 }
 0x169   :  { %v507_v62 = vmul.f32 0.00024414063, %v506_v61 }
 0x16b   :  { %v509_v63 = vadd.f32 1e-05, %v507_v62 }
 0x16d   :  { %615 = vrsqrt.f32 %v509_v63  ;;  %vm516_vm2 = vweird.f32 %v509_v63 }
 0x171   :  { %v550_v12 = vpop.permute.xlu0 %549 }
 0x172   :  { %v554_v14 = vperm.slane %v550_v12, %v797_v46 }
 0x173   :  { %v616_v50 = vpop.eup %615 }
 0x174   :  { %v511_v6 = vmul.f32 %v616_v50, %v509_v63  ;;  %vm517_vm1 = vweird.f32 %v616_v50 }
 0x175   :  { %vm518_vm3 = vmor %vm516_vm2, %vm517_vm1 }
 0x176   :  { %v512_v5 = vmul.f32 %v616_v50, %v511_v6 }
 0x178   :  { %v513_v59 = vmul.f32 0.5, %v512_v5 }
 0x17a   :  { %v514_v48 = vsub.f32 1.5, %v513_v59 }
 0x17c   :  { %v515_v4 = vmul.f32 %v616_v50, %v514_v48 }
 0x17e   :  { %v519_v8 = vsel %vm518_vm3, %v616_v50, %v515_v4 }
 0x17f   :  { %v520_v9 = vmul.f32 %v519_v8, %v508_v7 }
 0x181   :  { %523 = vperm.xlu2 %613, %v520_v9  }
 0x1db   :  { %v524_v11 = vpop.permute.xlu2 %523 }
 0x1dc   :  { %v528_v13 = vperm.slane %v524_v11, %v797_v46 }
 0x1de   :  { %v530_v15 = vmul.f32 %v528_v13, %v812_v52  ;;  %v531_v17 = vmul.f32 %v528_v13, %v808_v51  ;;  %v532_v18 = vmul.f32 %v528_v13, %v804_v49  ;;  %v533_v19 = vmul.f32 %v528_v13, %v816_v53 }
 0x1df   :  { %v534_v21 = vmul.f32 %v528_v13, %v836_v57  ;;  %v535_v23 = vmul.f32 %v528_v13, %v832_v3  ;;  %v536_v33 = vmul.f32 %v528_v13, %v828_v0  ;;  %v537_v29 = vmul.f32 %v528_v13, %v846_v10 }
 0x1e0   :  { %v556_v25 = vadd.f32 %v554_v14, %v530_v15  ;;  %v557_v26 = vadd.f32 %v554_v14, %v531_v17  ;;  %v558_v22 = vadd.f32 %v554_v14, %v532_v18  ;;  %v559_v46 = vadd.f32 %v554_v14, %v533_v19 }
 0x1e1   :  { %v538_v52 = vmul.f32 %v528_v13, %v862_v20  ;;  %v560_v30 = vadd.f32 %v554_v14, %v534_v21  ;;  %v539_v49 = vmul.f32 %v528_v13, %v855_v16  ;;  %v561_v51 = vadd.f32 %v554_v14, %v535_v23 }
 0x1e2   :  { %572 = vst [vmem:[#allocation5] sm:$0xff] %v556_v25  ;;  %v540_v53 = vmul.f32 %v528_v13, %v866_v24  ;;  %v562_v57 = vadd.f32 %v554_v14, %v536_v33  ;;  %v541_v0 = vmul.f32 %v528_v13, %v872_v28  ;;  %v563_v3 = vadd.f32 %v554_v14, %v537_v29 }
 0x1e3   :  { %573 = vst [vmem:[#allocation5 + $0x8] sm:$0xff] %v557_v26  ;;  %v542_v31 = vmul.f32 %v528_v13, %v884_v39  ;;  %v564_v10 = vadd.f32 %v554_v14, %v538_v52  ;;  %v543_v20 = vmul.f32 %v528_v13, %v888_v40  ;;  %v565_v27 = vadd.f32 %v554_v14, %v539_v49 }
 0x1e4   :  { %574 = vst [vmem:[#allocation5 + $0x10] sm:$0xff] %v558_v22  ;;  %v544_v16 = vmul.f32 %v528_v13, %v896_v41  ;;  %v566_v32 = vadd.f32 %v554_v14, %v540_v53  ;;  %v545_v24 = vmul.f32 %v528_v13, %v902_v1  ;;  %v567_v34 = vadd.f32 %v554_v14, %v541_v0 }
 0x1e5   :  { %575 = vst [vmem:[#allocation5 + $0x18] sm:$0xff] %v559_v46  ;;  %v568_v35 = vadd.f32 %v554_v14, %v542_v31  ;;  %v569_v28 = vadd.f32 %v554_v14, %v543_v20 }
 0x1e6   :  { %576 = vst [vmem:[#allocation5 + $0x20] sm:$0xff] %v560_v30  ;;  %v570_v36 = vadd.f32 %v554_v14, %v544_v16  ;;  %v571_v39 = vadd.f32 %v554_v14, %v545_v24 }
 0x1e7   :  { %577 = vst [vmem:[#allocation5 + $0x28] sm:$0xff] %v561_v51 }
 0x1e8   :  { %578 = vst [vmem:[#allocation5 + $0x30] sm:$0xff] %v562_v57 }
 0x1e9   :  { %579 = vst [vmem:[#allocation5 + $0x38] sm:$0xff] %v563_v3 }
 0x1ea   :  { %580 = vst [vmem:[#allocation5 + $0x40] sm:$0xff] %v564_v10 }
 0x1eb   :  { %581 = vst [vmem:[#allocation5 + $0x48] sm:$0xff] %v565_v27 }
 0x1ec   :  { %582 = vst [vmem:[#allocation5 + $0x50] sm:$0xff] %v566_v32 }
 0x1ed   :  { %583 = vst [vmem:[#allocation5 + $0x58] sm:$0xff] %v567_v34 }
 0x1ee   :  { %584 = vst [vmem:[#allocation5 + $0x60] sm:$0xff] %v568_v35 }
 0x1ef   :  { %585 = vst [vmem:[#allocation5 + $0x68] sm:$0xff] %v569_v28 }
 0x1f0   :  { %586 = vst [vmem:[#allocation5 + $0x70] sm:$0xff] %v570_v36 }
 0x1f1   :  { %587 = vst [vmem:[#allocation5 + $0x78] sm:$0xff] %v571_v39 }
 0x1f2   :  { %600 = dma.vmem_to_hbm [thread:$0]  %s593_s21, 2048, %s595_s24, [#allocation4], %s670_s17, %s670_s17, %s671_s18  }
 0x1f3   :  { %667 = dma.done.wait [#allocation4], 2048  }
 0x1f4   :  { %668 = vsyncadd [#allocation4], 4294965248 }
 0x1f5   :  { %605 = vsyncpa [#allocation3], 1 }
 0x1f6   :  { %606 = vsyncpa [#allocation4], 1 }

</bundles_post_ra>
